<compile_context>
chip_gen: v7x
topology: tpu7x:2x2x1
jax: 0.10.0
libtpu: 0.0.40
codegen_flags: <defaults>
</compile_context>

<pallas_src>
import functools

import jax
import jax.numpy as jnp
from jax import lax
from jax.experimental import pallas as pl
from jax.experimental.pallas import tpu as pltpu

_SMOOTH = 0.001
_LANES = 128
_CHUNK_ROWS = 512            # in-kernel accumulation chunk (rows of 128 lanes)
_MIB = 1024 * 1024


def _round_up(a, b):
    return (a + b - 1) // b * b


def _sublane_pack(dtype):
    # Rows of a (rows, 128) tile pack along sublanes: 8 (32-bit), 16 (16-bit),
    # 32 (8-bit).
    return max(8, 32 // jnp.dtype(dtype).itemsize)


@functools.lru_cache(maxsize=1)
def _vmem_config():
    """Returns (block_bytes_per_stream, vmem_limit_bytes) per TPU generation."""
    vmem_bytes = 0
    try:
        info = pltpu.get_tpu_info()
        vmem_bytes = int(getattr(info, "vmem_capacity_bytes", 0) or 0)
    except Exception:
        vmem_bytes = 0
    if vmem_bytes >= 96 * _MIB:
        # v5e / v6e: 128 MiB physical VMEM -> 8 MiB blocks, 2 in x 2 buf = 32 MiB.
        return 8 * _MIB, 64 * _MIB
    # v7x (64 MiB physical VMEM) or unknown: 4 MiB blocks -> 16 MiB of buffers.
    return 4 * _MIB, 40 * _MIB


def _dice_kernel(x_ref, t_ref, o_ref, *, block_rows, chunk_rows, tail_rows,
                 core_split, compute_dtype):
    """Accumulate [sum(x*t), sum(x+t)] partials into the resident output block.

    x_ref, t_ref : (block_rows, 128) input blocks (native dtype).
    o_ref        : (1, 2, 8, 128) f32 resident output block (per-core partials):
                     o[0,0] accumulates block-reduced x*t
                     o[0,1] accumulates block-reduced x+t
    """
    if core_split:
        c = pl.program_id(0)
        i = pl.program_id(1)
        is_last_block = jnp.logical_and(c == pl.num_programs(0) - 1,
                                        i == pl.num_programs(1) - 1)
    else:
        i = pl.program_id(0)
        is_last_block = i == pl.num_programs(0) - 1

    @pl.when(i == 0)
    def _init():
        o_ref[...] = jnp.zeros_like(o_ref)

    n_chunks = block_rows // chunk_rows
    g = chunk_rows // 8

    def _accumulate(valid_rows):
        def chunk_body(start, carry):
            p_acc, b_acc = carry
            x = x_ref[pl.ds(start, chunk_rows), :].astype(compute_dtype)
            t = t_ref[pl.ds(start, chunk_rows), :].astype(compute_dtype)
            prod = x * t
            both = x + t
            if valid_rows != block_rows:
                # Only traced for the (single) ragged last block; padded rows of
                # a partial block are unspecified VMEM, so select them to zero.
                row = lax.broadcasted_iota(jnp.int32, (chunk_rows, _LANES), 0) + start
                keep = row < valid_rows
                prod = jnp.where(keep, prod, jnp.zeros_like(prod))
                both = jnp.where(keep, both, jnp.zeros_like(both))
            p_acc = p_acc + jnp.sum(
                prod.astype(jnp.float32).reshape(g, 8, _LANES), axis=0)
            b_acc = b_acc + jnp.sum(
                both.astype(jnp.float32).reshape(g, 8, _LANES), axis=0)
            return p_acc, b_acc

        zeros = jnp.zeros((8, _LANES), jnp.float32)
        if n_chunks == 1:
            p, b = chunk_body(0, (zeros, zeros))
        else:
            p, b = lax.fori_loop(
                0, n_chunks,
                lambda j, carry: chunk_body(
                    pl.multiple_of(j * chunk_rows, chunk_rows), carry),
                (zeros, zeros),
                unroll=min(4, n_chunks))
        # One accumulator read-modify-write per stream per grid step.
        o_ref[0, 0, :, :] += p
        o_ref[0, 1, :, :] += b

    if tail_rows == 0:
        _accumulate(block_rows)
    else:
        @pl.when(jnp.logical_not(is_last_block))
        def _steady():
            _accumulate(block_rows)

        @pl.when(is_last_block)
        def _ragged_tail():
            _accumulate(tail_rows)


@functools.partial(jax.jit, static_argnames=("block_rows",))
def dice_loss(inp, target, block_rows=None):
    """Scalar soft-Dice loss, matching DiceLoss().forward(input, target)."""
    assert inp.size == target.size, "input and target must have the same size"
    x = jnp.ravel(inp)
    t = jnp.ravel(target)
    n = x.shape[0]

    native_bf16 = (inp.dtype == jnp.bfloat16) and (target.dtype == jnp.bfloat16)
    compute_dtype = jnp.bfloat16 if native_bf16 else jnp.float32
    pack = max(_sublane_pack(inp.dtype), _sublane_pack(target.dtype))

    # Kernel consumes the (pack*128)-aligned prefix; the < pack*128-element
    # remainder is summed in plain JAX (no full-array pad / mask in steady state).
    n_main = (n // (pack * _LANES)) * (pack * _LANES)
    rows = n_main // _LANES

    if n_main < n:
        tx = x[n_main:].astype(jnp.float32)
        tt = t[n_main:].astype(jnp.float32)
        tail_prod = jnp.sum(tx * tt)
        tail_both = jnp.sum(tx) + jnp.sum(tt)
    else:
        tail_prod = jnp.float32(0.0)
        tail_both = jnp.float32(0.0)

    if rows == 0:
        intersection = tail_prod
        denom = tail_both
    else:
        x2 = x[:n_main].reshape(rows, _LANES)
        t2 = t[:n_main].reshape(rows, _LANES)

        block_bytes, vmem_limit = _vmem_config()
        itemsize = max(jnp.dtype(inp.dtype).itemsize,
                       jnp.dtype(target.dtype).itemsize)
        if block_rows is None:
            target_rows = max(pack, block_bytes // (_LANES * itemsize))
            br = min(rows, target_rows)
            br = (br // pack) * pack
            if br >= _CHUNK_ROWS:
                br = (br // _CHUNK_ROWS) * _CHUNK_ROWS
        else:
            br = min(rows, _round_up(int(block_rows), pack))
        br = max(pack, br)
        chunk_rows = _CHUNK_ROWS if (br >= _CHUNK_ROWS and br % _CHUNK_ROWS == 0) else br

        total_blocks = pl.cdiv(rows, br)
        tail_rows = rows % br

        # 2-way core split when the block range splits evenly: harmless serial
        # reorder on 1-TC chips, uses both TensorCores/HBM streams on v7x.
        core_split = (total_blocks >= 2) and (total_blocks % 2 == 0)
        if core_split:
            half = total_blocks // 2
            grid = (2, half)
            in_index = lambda c, i: (c * half + i, 0)
            out_index = lambda c, i: (c, 0, 0, 0)
            dim_sem = ("parallel", "arbitrary")
            n_out = 2
        else:
            grid = (total_blocks,)
            in_index = lambda i: (i, 0)
            out_index = lambda i: (0, 0, 0, 0)
            dim_sem = ("arbitrary",)
            n_out = 1

        kernel = functools.partial(
            _dice_kernel, block_rows=br, chunk_rows=chunk_rows,
            tail_rows=tail_rows, core_split=core_split,
            compute_dtype=compute_dtype)

        partials = pl.pallas_call(
            kernel,
            out_shape=jax.ShapeDtypeStruct((n_out, 2, 8, _LANES), jnp.float32),
            grid_spec=pltpu.PrefetchScalarGridSpec(
                num_scalar_prefetch=0,
                grid=grid,
                in_specs=[pl.BlockSpec((br, _LANES), in_index),
                          pl.BlockSpec((br, _LANES), in_index)],
                out_specs=pl.BlockSpec((1, 2, 8, _LANES), out_index),
            ),
            compiler_params=pltpu.CompilerParams(
                dimension_semantics=dim_sem,
                vmem_limit_bytes=vmem_limit,
            ),
        )(x2, t2)

        intersection = jnp.sum(partials[:, 0]) + tail_prod
        denom = jnp.sum(partials[:, 1]) + tail_both

    smooth = jnp.float32(_SMOOTH)
    return 1.0 - (2.0 * intersection + smooth) / (denom + smooth)


def _reference_dice_loss(inp, target, smooth=_SMOOTH):
    iflat = jnp.ravel(inp).astype(jnp.float32)
    tflat = jnp.ravel(target).astype(jnp.float32)
    intersection = jnp.sum(iflat * tflat)
    return 1.0 - (2.0 * intersection + smooth) / (
        jnp.sum(iflat) + jnp.sum(tflat) + smooth)


if __name__ == "__main__":
    key = jax.random.PRNGKey(0)
    k = jax.random.split(key, 12)

    def check(inp, tgt, rtol, atol, **kw):
        got = jax.block_until_ready(dice_loss(inp, tgt, **kw))
        ref = _reference_dice_loss(inp, tgt)
        assert jnp.allclose(got, ref, rtol=rtol, atol=atol), (got, ref, kw)

    # --- Case 1: NCHW-style (2,4,16,16) f32 — single-block kernel path.
    shape1 = (2, 4, 16, 16)
    inp1 = jax.nn.sigmoid(jax.random.normal(k[0], shape1, dtype=jnp.float32))
    tgt1 = jax.random.bernoulli(k[1], 0.5, shape1).astype(jnp.float32)
    check(inp1, tgt1, rtol=1e-5, atol=1e-6)

    # --- Case 2: same data, tiny blocks -> 2-way core-split grid (2, 1).
    check(inp1, tgt1, rtol=1e-5, atol=1e-6, block_rows=8)

    # --- Case 3: (2,4,30,64) f32, block_rows=16 -> split grid (2,4) with a
    #     masked ragged last block (120 rows, tail of 8 rows).
    shape3 = (2, 4, 30, 64)
    inp3 = jax.nn.sigmoid(jax.random.normal(k[2], shape3, dtype=jnp.float32))
    tgt3 = jax.random.bernoulli(k[3], 0.5, shape3).astype(jnp.float32)
    check(inp3, tgt3, rtol=1e-5, atol=1e-6, block_rows=16)

    # --- Case 4: (4,8,64,64) f32 -> 1024 rows, chunked fori_loop accumulation.
    shape4 = (4, 8, 64, 64)
    inp4 = jax.nn.sigmoid(jax.random.normal(k[4], shape4, dtype=jnp.float32))
    tgt4 = jax.random.bernoulli(k[5], 0.5, shape4).astype(jnp.float32)
    check(inp4, tgt4, rtol=1e-5, atol=1e-6)

    # --- Case 5: tiny ragged bf16 (462 elements) -> pure JAX tail path.
    shape5 = (2, 3, 11, 7)
    inp5 = jax.nn.sigmoid(
        jax.random.normal(k[6], shape5, dtype=jnp.float32)).astype(jnp.bfloat16)
    tgt5 = jax.random.bernoulli(k[7], 0.5, shape5).astype(jnp.bfloat16)
    check(inp5, tgt5, rtol=1e-5, atol=1e-5)

    # --- Case 6: bf16 kernel path (native bf16 elementwise, f32 accumulate)
    #     plus a 384-element JAX tail; looser tolerance vs the f32 reference.
    shape6 = (2, 4, 33, 48)
    inp6 = jax.nn.sigmoid(
        jax.random.normal(k[8], shape6, dtype=jnp.float32)).astype(jnp.bfloat16)
    tgt6 = jax.random.bernoulli(k[9], 0.5, shape6).astype(jnp.bfloat16)
    check(inp6, tgt6, rtol=2e-2, atol=5e-3, block_rows=32)

    print("KERNEL_OK")
</pallas_src>

<mosaic_0001>
module attributes {stable_mosaic.version = 11 : i64} {
  func.func @_dice_kernel(%arg0: i32, %arg1: memref<16x128xf32, #tpu.memory_space<vmem>>, %arg2: memref<16x128xf32, #tpu.memory_space<vmem>>, %arg3: memref<1x2x8x128xf32, #tpu.memory_space<vmem>>) attributes {dimension_semantics = [#tpu.dimension_semantics<arbitrary>], iteration_bounds = array<i64: 1>, scalar_prefetch = 0 : i64, scratch_operands = 0 : i64, tpu.core_type = #tpu.core_type<tc>, window_params = [{transform_indices = @transform_0, window_bounds = array<i64: 16, 128>}, {transform_indices = @transform_1, window_bounds = array<i64: 16, 128>}, {pipeline_mode = #tpu.pipeline_mode<synchronous>, transform_indices = @transform_2, window_bounds = array<i64: 1, 2, 8, 128>}]} {
    %c0_i32 = arith.constant 0 : i32
    %0 = arith.cmpi eq, %arg0, %c0_i32 : i32
    %1 = arith.extui %0 : i1 to i32
    %c0_i32_0 = arith.constant 0 : i32
    %2 = arith.cmpi ne, %1, %c0_i32_0 : i32
    scf.if %2 {
      %cst_21 = arith.constant 0.000000e+00 : f32
      %26 = vector.broadcast %cst_21 : f32 to vector<1x2x8x128xf32>
      %c0_22 = arith.constant 0 : index
      %c0_23 = arith.constant 0 : index
      %c0_24 = arith.constant 0 : index
      %c0_25 = arith.constant 0 : index
      %27 = vector.load %arg3[%c0_22, %c0_23, %c0_24, %c0_25] : memref<1x2x8x128xf32, #tpu.memory_space<vmem>>, vector<1x2x8x128xf32>
      tpu.vector_store %arg3[%c0_22, %c0_23, %c0_24, %c0_25], %26 {strides = array<i32>} : memref<1x2x8x128xf32, #tpu.memory_space<vmem>>, vector<1x2x8x128xf32>,
    } else {
    }
    %cst = arith.constant 0.000000e+00 : f32
    %3 = vector.broadcast %cst : f32 to vector<8x128xf32>
    %c0 = arith.constant 0 : index
    %c0_1 = arith.constant 0 : index
    %4 = vector.load %arg1[%c0, %c0_1] : memref<16x128xf32, #tpu.memory_space<vmem>>, vector<16x128xf32>
    %c0_2 = arith.constant 0 : index
    %c0_3 = arith.constant 0 : index
    %5 = vector.load %arg2[%c0_2, %c0_3] : memref<16x128xf32, #tpu.memory_space<vmem>>, vector<16x128xf32>
    %6 = arith.mulf %4, %5 : vector<16x128xf32>
    %7 = arith.addf %4, %5 : vector<16x128xf32>
    %8 = vector.shape_cast %6 : vector<16x128xf32> to vector<2x8x128xf32>
    %cst_4 = arith.constant dense<0.000000e+00> : vector<8x128xf32>
    %9 = vector.multi_reduction <add>, %8, %cst_4 [0] : vector<2x8x128xf32> to vector<8x128xf32>
    %10 = arith.addf %3, %9 : vector<8x128xf32>
    %11 = vector.shape_cast %7 : vector<16x128xf32> to vector<2x8x128xf32>
    %cst_5 = arith.constant dense<0.000000e+00> : vector<8x128xf32>
    %12 = vector.multi_reduction <add>, %11, %cst_5 [0] : vector<2x8x128xf32> to vector<8x128xf32>
    %13 = arith.addf %3, %12 : vector<8x128xf32>
    %c0_6 = arith.constant 0 : index
    %c0_7 = arith.constant 0 : index
    %c0_8 = arith.constant 0 : index
    %c0_9 = arith.constant 0 : index
    %14 = vector.load %arg3[%c0_6, %c0_7, %c0_8, %c0_9] : memref<1x2x8x128xf32, #tpu.memory_space<vmem>>, vector<1x1x8x128xf32>
    %15 = vector.shape_cast %14 : vector<1x1x8x128xf32> to vector<8x128xf32>
    %16 = arith.addf %15, %10 : vector<8x128xf32>
    %c0_10 = arith.constant 0 : index
    %c0_11 = arith.constant 0 : index
    %c0_12 = arith.constant 0 : index
    %c0_13 = arith.constant 0 : index
    %17 = vector.load %arg3[%c0_10, %c0_11, %c0_12, %c0_13] : memref<1x2x8x128xf32, #tpu.memory_space<vmem>>, vector<1x1x8x128xf32>
    %18 = vector.shape_cast %17 : vector<1x1x8x128xf32> to vector<8x128xf32>
    %19 = vector.shape_cast %16 : vector<8x128xf32> to vector<1x1x8x128xf32>
    tpu.vector_store %arg3[%c0_10, %c0_11, %c0_12, %c0_13], %19 {strides = array<i32>} : memref<1x2x8x128xf32, #tpu.memory_space<vmem>>, vector<1x1x8x128xf32>,
    %c0_14 = arith.constant 0 : index
    %c1 = arith.constant 1 : index
    %c0_15 = arith.constant 0 : index
    %c0_16 = arith.constant 0 : index
    %20 = vector.load %arg3[%c0_14, %c1, %c0_15, %c0_16] : memref<1x2x8x128xf32, #tpu.memory_space<vmem>>, vector<1x1x8x128xf32>
    %21 = vector.shape_cast %20 : vector<1x1x8x128xf32> to vector<8x128xf32>
    %22 = arith.addf %21, %13 : vector<8x128xf32>
    %c0_17 = arith.constant 0 : index
    %c1_18 = arith.constant 1 : index
    %c0_19 = arith.constant 0 : index
    %c0_20 = arith.constant 0 : index
    %23 = vector.load %arg3[%c0_17, %c1_18, %c0_19, %c0_20] : memref<1x2x8x128xf32, #tpu.memory_space<vmem>>, vector<1x1x8x128xf32>
    %24 = vector.shape_cast %23 : vector<1x1x8x128xf32> to vector<8x128xf32>
    %25 = vector.shape_cast %22 : vector<8x128xf32> to vector<1x1x8x128xf32>
    tpu.vector_store %arg3[%c0_17, %c1_18, %c0_19, %c0_20], %25 {strides = array<i32>} : memref<1x2x8x128xf32, #tpu.memory_space<vmem>>, vector<1x1x8x128xf32>,
    return
  }
  func.func @transform_0(%arg0: i32) -> (i32, i32) {
    %c0_i32 = arith.constant 0 : i32
    %c0_i32_0 = arith.constant 0 : i32
    return %arg0, %c0_i32 : i32, i32
  }
  func.func @transform_1(%arg0: i32) -> (i32, i32) {
    %c0_i32 = arith.constant 0 : i32
    %c0_i32_0 = arith.constant 0 : i32
    return %arg0, %c0_i32 : i32, i32
  }
  func.func @transform_2(%arg0: i32) -> (i32, i32, i32, i32) {
    %c0_i32 = arith.constant 0 : i32
    %c0_i32_0 = arith.constant 0 : i32
    %c0_i32_1 = arith.constant 0 : i32
    %c0_i32_2 = arith.constant 0 : i32
    %c0_i32_3 = arith.constant 0 : i32
    return %c0_i32, %c0_i32_0, %c0_i32_1, %c0_i32_2 : i32, i32, i32, i32
  }
}

</mosaic_0001>

<bundles_post_ra>
// kernel: dice_loss.1
= control target key start
LH: loop header
LB: loop body
LE: loop exit
PB: predicated region body
PF: predicated region fallthrough
CT: control target
= control target key end

     0   :  { %s76_s0 = inlined_call_operand.vmem [shape: f32[16,128], index: 0, kind: input, shape index: {}]   ;;  %s77_s1 = inlined_call_operand.vmem [shape: f32[16,128], index: 1, kind: input, shape index: {}]   ;;  %s78_s2 = inlined_call_operand.vmem [shape: f32[1,2,8,128], index: 2, kind: output, shape index: {}]  }
   0x1   :  { %v17_v0 = vld [vmem:[%s76_s0] sm:$0xff]  ;;  %v18_v1 = vld [vmem:[%s76_s0 + $0x8] sm:$0xff] }
   0x2   :  { %v19_v2 = vld [vmem:[%s77_s1] sm:$0xff]  ;;  %v20_v3 = vld [vmem:[%s77_s1 + $0x8] sm:$0xff] }
   0x3   :  { %v21_v4 = vmul.f32 %v19_v2, %v17_v0  ;;  %v23_v5 = vadd.f32 %v19_v2, %v17_v0  ;;  %v22_v6 = vmul.f32 %v20_v3, %v18_v1  ;;  %v24_v7 = vadd.f32 %v20_v3, %v18_v1 }
   0x5   :  { %v25_v8 = vadd.f32 %v22_v6, %v21_v4  ;;  %v27_v9 = vadd.f32 %v24_v7, %v23_v5 }
   0x7   :  { %31 = vst [vmem:[%s78_s2] sm:$0xff] %v25_v8  ;;  %41 = vst [vmem:[%s78_s2 + $0x8] sm:$0xff] %v27_v9 }

</bundles_post_ra>
